<compile_context>
chip_gen: v5e
topology: v5e:2x2
jax: 0.10.0
libtpu: 0.0.40
codegen_flags: <defaults>
</compile_context>

<pallas_src>
import jax
import jax.numpy as jnp
from jax.experimental import pallas as pl
from jax.experimental.pallas import tpu as pltpu

# ---- static problem sizes (small, consistent with the module) --------------
N, H, W, C = 2, 16, 16, 3          # batch of 2 RGB 16x16 "images"
NC = 3                             # number of classes
NO = 5 + NC                        # (x, y, w, h, obj, cls...)
HW = H * W
NHW = N * HW                       # 512 -> lane-dense (multiple of 128)

CONF_THRES = 0.25                  # autoShape.conf
IOU_THRES = 0.45                   # autoShape.iou
# TODO(synk): the IoU-suppression loop inside non_max_suppression is
# data-dependent / variable-shape and has no clean fixed-shape Pallas
# equivalent; only the confidence threshold is applied (kept fixed-shape by
# zeroing the confidence of rejected boxes instead of dropping rows).


# ---------------------------------------------------------------------------
# Single fused kernel: preprocess (/255) + synthetic 1x1-conv detection head
# (VPU FMAs) + sigmoid + box decode + confidence gate + Detections box math
# (xyxy2xywh, xyxy/gn, xywh/gn).  One grid step, whole batch in one block,
# one fused (32, NHW) output written as four full (8, NHW) tiles.
# ---------------------------------------------------------------------------
def _fused_kernel(x_ref, w_ref, b_ref, inv_gn_ref, out_ref):
    # x_ref      : (C, NHW)   VMEM, raw pixels in [0, 255]
    # w_ref      : (C*NO,)    SMEM scalars (1x1-conv head weights, flattened)
    # b_ref      : (NO,)      SMEM scalars (head bias)
    # inv_gn_ref : (6,)       SMEM scalars 1/gn = [1/W, 1/H, 1/W, 1/H, 1, 1]
    # out_ref    : (32, NHW)  VMEM: rows [0:8) pred, [8:16) xywh,
    #                               [16:24) xyxyn, [24:32) xywhn (6 live rows
    #                               + 2 zero-pad rows per group)

    # ---- hoist all SMEM scalar reads out of the hot tail --------------------
    wv = [[w_ref[c * NO + o] for o in range(NO)] for c in range(C)]
    bv = [b_ref[o] for o in range(NO)]
    gv = [inv_gn_ref[i] for i in range(6)]

    inv255 = jnp.float32(1.0 / 255.0)
    xr = [x_ref[c:c + 1, :] * inv255 for c in range(C)]      # preprocess /255

    def head_row(o):
        # unrolled scalar-broadcast FMA over C=3 channels (pure VPU, no MXU)
        acc = xr[0] * wv[0][o]
        for c in range(1, C):
            acc = acc + xr[c] * wv[c][o]
        return jax.nn.sigmoid(acc + bv[o])                   # (1, NHW), EUP

    p = [head_row(o) for o in range(NO)]                     # NO=8 rows

    # decode normalized xywh -> pixel xyxy
    cx = p[0] * float(W)
    cy = p[1] * float(H)
    bw = p[2] * float(W)
    bh = p[3] * float(H)
    x1 = cx - 0.5 * bw
    y1 = cy - 0.5 * bh
    x2 = cx + 0.5 * bw
    y2 = cy + 0.5 * bh

    # class best / first-index argmax across the NC rows: elementwise VPU ops
    best = p[5]
    cls = jnp.zeros_like(best)
    for k in range(1, NC):
        better = p[5 + k] > best
        best = jnp.where(better, p[5 + k], best)
        cls = jnp.where(better, jnp.float32(k), cls)
    conf = p[4] * best
    conf = jnp.where(conf >= CONF_THRES, conf, jnp.float32(0.0))   # conf gate

    # Detections: xyxy2xywh
    xc = (x1 + x2) * 0.5
    yc = (y1 + y2) * 0.5
    ww = x2 - x1
    hh = y2 - y1

    zero = jnp.zeros_like(x1)                                # (1, NHW) pad row
    pred_rows = (x1, y1, x2, y2, conf, cls)
    xywh_rows = (xc, yc, ww, hh, conf, cls)
    xyxyn_rows = tuple(r * g for r, g in zip(pred_rows, gv))
    xywhn_rows = tuple(r * g for r, g in zip(xywh_rows, gv))

    # Four full-tile (8, NHW) stores on 8-sublane-aligned boundaries: row
    # packing goes through the (otherwise idle) XLU; no masked vst.
    out_ref[0:8, :] = jnp.concatenate(pred_rows + (zero, zero), axis=0)
    out_ref[8:16, :] = jnp.concatenate(xywh_rows + (zero, zero), axis=0)
    out_ref[16:24, :] = jnp.concatenate(xyxyn_rows + (zero, zero), axis=0)
    out_ref[24:32, :] = jnp.concatenate(xywhn_rows + (zero, zero), axis=0)


def run_autoshape(imgs, w, b, inv_gn):
    """imgs: (N, H, W, C) float32 in [0, 255]
       -> fused (32, N*HW) slab: rows [0:6) pred (x1,y1,x2,y2,conf,cls),
          [8:14) xywh, [16:22) xyxyn, [24:30) xywhn (pad rows are zero)."""
    # layout plumbing (outside the kernel): NHWC -> (C, N*HW) lane-dense slab
    x = jnp.transpose(imgs, (3, 0, 1, 2)).reshape(C, NHW)
    w_flat = w.reshape(C * NO)                               # 1-D SMEM (no 2-D pad)
    fused = pl.pallas_call(
        _fused_kernel,
        out_shape=jax.ShapeDtypeStruct((32, NHW), jnp.float32),
        in_specs=[
            pl.BlockSpec(memory_space=pltpu.MemorySpace.VMEM),   # x
            pl.BlockSpec(memory_space=pltpu.MemorySpace.SMEM),   # w (flat)
            pl.BlockSpec(memory_space=pltpu.MemorySpace.SMEM),   # b
            pl.BlockSpec(memory_space=pltpu.MemorySpace.SMEM),   # 1/gn
        ],
        out_specs=pl.BlockSpec(memory_space=pltpu.MemorySpace.VMEM),
    )(x, w_flat, b, inv_gn)
    return fused


def unpack_detections(fused):
    """ONE transpose on the single fused slab -> user-facing (N, HW, 6) views.
    Returns (pred, xywh, xyxyn, xywhn)."""
    g = jnp.transpose(fused.reshape(4, 8, N, HW), (0, 2, 3, 1))[..., :6]
    return g[0], g[1], g[2], g[3]


# ---------------------------------------------------------------------------
# Plain-JAX reference (sanity check against the fused kernel).
# ---------------------------------------------------------------------------
def reference(imgs, w, b, inv_gn):
    x = imgs.reshape(N, HW, C) / 255.0
    p = jax.nn.sigmoid(jnp.einsum("nkc,co->nko", x, w) + b[None, None, :])
    cx, cy = p[..., 0:1] * W, p[..., 1:2] * H
    bw, bh = p[..., 2:3] * W, p[..., 3:4] * H
    x1, y1, x2, y2 = cx - bw / 2, cy - bh / 2, cx + bw / 2, cy + bh / 2
    obj, cls_p = p[..., 4:5], p[..., 5:]
    best = jnp.max(cls_p, axis=-1, keepdims=True)
    cls = jnp.argmax(cls_p, axis=-1, keepdims=True).astype(jnp.float32)
    conf = jnp.where(obj * best >= CONF_THRES, obj * best, 0.0)
    pred = jnp.concatenate([x1, y1, x2, y2, conf, cls], axis=-1)
    xywh = jnp.concatenate(
        [(x1 + x2) / 2, (y1 + y2) / 2, x2 - x1, y2 - y1, conf, cls], axis=-1)
    inv_g = inv_gn[None, None, :]
    return pred, xywh, pred * inv_g, xywh * inv_g


if __name__ == "__main__":
    key = jax.random.PRNGKey(0)
    k_img, k_w, k_b = jax.random.split(key, 3)

    # deterministic synthetic inputs / parameters
    imgs = jax.random.uniform(k_img, (N, H, W, C), jnp.float32) * 255.0
    w = jax.random.normal(k_w, (C, NO), jnp.float32) * 0.5
    b = jax.random.normal(k_b, (NO,), jnp.float32) * 0.1

    # gn = [W, H, W, H, 1, 1]; all images share the network shape here, so
    # scale_coords is the identity and 1/gn is a single host-side constant.
    inv_gn = 1.0 / jnp.array([W, H, W, H, 1.0, 1.0], jnp.float32)

    fused = run_autoshape(imgs, w, b, inv_gn)
    jax.block_until_ready(fused)

    # one transpose on the fused slab for the user-facing layout
    pred, xywh, xyxyn, xywhn = unpack_detections(fused)
    jax.block_until_ready((pred, xywh, xyxyn, xywhn))

    # sanity check vs plain-JAX reference
    r_pred, r_xywh, r_xyxyn, r_xywhn = reference(imgs, w, b, inv_gn)
    for a, r in ((pred, r_pred), (xywh, r_xywh),
                 (xyxyn, r_xyxyn), (xywhn, r_xywhn)):
        assert jnp.allclose(a, r, atol=1e-4, rtol=1e-4), "mismatch vs reference"

    print("KERNEL_OK")
</pallas_src>

<mosaic_0001>
module attributes {stable_mosaic.version = 11 : i64} {
  func.func @_fused_kernel(%arg0: memref<3x512xf32, #tpu.memory_space<vmem>>, %arg1: memref<24xf32, #tpu.memory_space<smem>>, %arg2: memref<8xf32, #tpu.memory_space<smem>>, %arg3: memref<6xf32, #tpu.memory_space<smem>>, %arg4: memref<32x512xf32, #tpu.memory_space<vmem>>) attributes {dimension_semantics = [], scalar_prefetch = 0 : i64, scratch_operands = 0 : i64, tpu.core_type = #tpu.core_type<tc>} {
    %c0 = arith.constant 0 : index
    %0 = memref.load %arg1[%c0] : memref<24xf32, #tpu.memory_space<smem>>
    %c1 = arith.constant 1 : index
    %1 = memref.load %arg1[%c1] : memref<24xf32, #tpu.memory_space<smem>>
    %c2 = arith.constant 2 : index
    %2 = memref.load %arg1[%c2] : memref<24xf32, #tpu.memory_space<smem>>
    %c3 = arith.constant 3 : index
    %3 = memref.load %arg1[%c3] : memref<24xf32, #tpu.memory_space<smem>>
    %c4 = arith.constant 4 : index
    %4 = memref.load %arg1[%c4] : memref<24xf32, #tpu.memory_space<smem>>
    %c5 = arith.constant 5 : index
    %5 = memref.load %arg1[%c5] : memref<24xf32, #tpu.memory_space<smem>>
    %c6 = arith.constant 6 : index
    %6 = memref.load %arg1[%c6] : memref<24xf32, #tpu.memory_space<smem>>
    %c7 = arith.constant 7 : index
    %7 = memref.load %arg1[%c7] : memref<24xf32, #tpu.memory_space<smem>>
    %c8 = arith.constant 8 : index
    %8 = memref.load %arg1[%c8] : memref<24xf32, #tpu.memory_space<smem>>
    %c9 = arith.constant 9 : index
    %9 = memref.load %arg1[%c9] : memref<24xf32, #tpu.memory_space<smem>>
    %c10 = arith.constant 10 : index
    %10 = memref.load %arg1[%c10] : memref<24xf32, #tpu.memory_space<smem>>
    %c11 = arith.constant 11 : index
    %11 = memref.load %arg1[%c11] : memref<24xf32, #tpu.memory_space<smem>>
    %c12 = arith.constant 12 : index
    %12 = memref.load %arg1[%c12] : memref<24xf32, #tpu.memory_space<smem>>
    %c13 = arith.constant 13 : index
    %13 = memref.load %arg1[%c13] : memref<24xf32, #tpu.memory_space<smem>>
    %c14 = arith.constant 14 : index
    %14 = memref.load %arg1[%c14] : memref<24xf32, #tpu.memory_space<smem>>
    %c15 = arith.constant 15 : index
    %15 = memref.load %arg1[%c15] : memref<24xf32, #tpu.memory_space<smem>>
    %c16 = arith.constant 16 : index
    %16 = memref.load %arg1[%c16] : memref<24xf32, #tpu.memory_space<smem>>
    %c17 = arith.constant 17 : index
    %17 = memref.load %arg1[%c17] : memref<24xf32, #tpu.memory_space<smem>>
    %c18 = arith.constant 18 : index
    %18 = memref.load %arg1[%c18] : memref<24xf32, #tpu.memory_space<smem>>
    %c19 = arith.constant 19 : index
    %19 = memref.load %arg1[%c19] : memref<24xf32, #tpu.memory_space<smem>>
    %c20 = arith.constant 20 : index
    %20 = memref.load %arg1[%c20] : memref<24xf32, #tpu.memory_space<smem>>
    %c21 = arith.constant 21 : index
    %21 = memref.load %arg1[%c21] : memref<24xf32, #tpu.memory_space<smem>>
    %c22 = arith.constant 22 : index
    %22 = memref.load %arg1[%c22] : memref<24xf32, #tpu.memory_space<smem>>
    %c23 = arith.constant 23 : index
    %23 = memref.load %arg1[%c23] : memref<24xf32, #tpu.memory_space<smem>>
    %c0_0 = arith.constant 0 : index
    %24 = memref.load %arg2[%c0_0] : memref<8xf32, #tpu.memory_space<smem>>
    %c1_1 = arith.constant 1 : index
    %25 = memref.load %arg2[%c1_1] : memref<8xf32, #tpu.memory_space<smem>>
    %c2_2 = arith.constant 2 : index
    %26 = memref.load %arg2[%c2_2] : memref<8xf32, #tpu.memory_space<smem>>
    %c3_3 = arith.constant 3 : index
    %27 = memref.load %arg2[%c3_3] : memref<8xf32, #tpu.memory_space<smem>>
    %c4_4 = arith.constant 4 : index
    %28 = memref.load %arg2[%c4_4] : memref<8xf32, #tpu.memory_space<smem>>
    %c5_5 = arith.constant 5 : index
    %29 = memref.load %arg2[%c5_5] : memref<8xf32, #tpu.memory_space<smem>>
    %c6_6 = arith.constant 6 : index
    %30 = memref.load %arg2[%c6_6] : memref<8xf32, #tpu.memory_space<smem>>
    %c7_7 = arith.constant 7 : index
    %31 = memref.load %arg2[%c7_7] : memref<8xf32, #tpu.memory_space<smem>>
    %c0_8 = arith.constant 0 : index
    %32 = memref.load %arg3[%c0_8] : memref<6xf32, #tpu.memory_space<smem>>
    %c1_9 = arith.constant 1 : index
    %33 = memref.load %arg3[%c1_9] : memref<6xf32, #tpu.memory_space<smem>>
    %c2_10 = arith.constant 2 : index
    %34 = memref.load %arg3[%c2_10] : memref<6xf32, #tpu.memory_space<smem>>
    %c3_11 = arith.constant 3 : index
    %35 = memref.load %arg3[%c3_11] : memref<6xf32, #tpu.memory_space<smem>>
    %c4_12 = arith.constant 4 : index
    %36 = memref.load %arg3[%c4_12] : memref<6xf32, #tpu.memory_space<smem>>
    %c5_13 = arith.constant 5 : index
    %37 = memref.load %arg3[%c5_13] : memref<6xf32, #tpu.memory_space<smem>>
    %c0_14 = arith.constant 0 : index
    %c0_15 = arith.constant 0 : index
    %38 = vector.load %arg0[%c0_14, %c0_15] : memref<3x512xf32, #tpu.memory_space<vmem>>, vector<1x512xf32>
    %cst = arith.constant 0.00392156886 : f32
    %39 = vector.broadcast %cst : f32 to vector<1x512xf32>
    %40 = arith.mulf %38, %39 : vector<1x512xf32>
    %c1_16 = arith.constant 1 : index
    %c0_17 = arith.constant 0 : index
    %41 = vector.load %arg0[%c1_16, %c0_17] : memref<3x512xf32, #tpu.memory_space<vmem>>, vector<1x512xf32>
    %cst_18 = arith.constant 0.00392156886 : f32
    %42 = vector.broadcast %cst_18 : f32 to vector<1x512xf32>
    %43 = arith.mulf %41, %42 : vector<1x512xf32>
    %c2_19 = arith.constant 2 : index
    %c0_20 = arith.constant 0 : index
    %44 = vector.load %arg0[%c2_19, %c0_20] : memref<3x512xf32, #tpu.memory_space<vmem>>, vector<1x512xf32>
    %cst_21 = arith.constant 0.00392156886 : f32
    %45 = vector.broadcast %cst_21 : f32 to vector<1x512xf32>
    %46 = arith.mulf %44, %45 : vector<1x512xf32>
    %47 = vector.broadcast %0 : f32 to vector<1x512xf32>
    %48 = arith.mulf %40, %47 : vector<1x512xf32>
    %49 = vector.broadcast %8 : f32 to vector<1x512xf32>
    %50 = arith.mulf %43, %49 : vector<1x512xf32>
    %51 = arith.addf %48, %50 : vector<1x512xf32>
    %52 = vector.broadcast %16 : f32 to vector<1x512xf32>
    %53 = arith.mulf %46, %52 : vector<1x512xf32>
    %54 = arith.addf %51, %53 : vector<1x512xf32>
    %55 = vector.broadcast %24 : f32 to vector<1x512xf32>
    %56 = arith.addf %54, %55 : vector<1x512xf32>
    %57 = arith.negf %56 : vector<1x512xf32>
    %58 = math.exp %57 : vector<1x512xf32>
    %cst_22 = arith.constant 1.000000e+00 : f32
    %59 = vector.broadcast %cst_22 : f32 to vector<1x512xf32>
    %60 = arith.addf %59, %58 : vector<1x512xf32>
    %61 = arith.divf %59, %60 : vector<1x512xf32>
    %62 = vector.broadcast %1 : f32 to vector<1x512xf32>
    %63 = arith.mulf %40, %62 : vector<1x512xf32>
    %64 = vector.broadcast %9 : f32 to vector<1x512xf32>
    %65 = arith.mulf %43, %64 : vector<1x512xf32>
    %66 = arith.addf %63, %65 : vector<1x512xf32>
    %67 = vector.broadcast %17 : f32 to vector<1x512xf32>
    %68 = arith.mulf %46, %67 : vector<1x512xf32>
    %69 = arith.addf %66, %68 : vector<1x512xf32>
    %70 = vector.broadcast %25 : f32 to vector<1x512xf32>
    %71 = arith.addf %69, %70 : vector<1x512xf32>
    %72 = arith.negf %71 : vector<1x512xf32>
    %73 = math.exp %72 : vector<1x512xf32>
    %cst_23 = arith.constant 1.000000e+00 : f32
    %74 = vector.broadcast %cst_23 : f32 to vector<1x512xf32>
    %75 = arith.addf %74, %73 : vector<1x512xf32>
    %76 = arith.divf %74, %75 : vector<1x512xf32>
    %77 = vector.broadcast %2 : f32 to vector<1x512xf32>
    %78 = arith.mulf %40, %77 : vector<1x512xf32>
    %79 = vector.broadcast %10 : f32 to vector<1x512xf32>
    %80 = arith.mulf %43, %79 : vector<1x512xf32>
    %81 = arith.addf %78, %80 : vector<1x512xf32>
    %82 = vector.broadcast %18 : f32 to vector<1x512xf32>
    %83 = arith.mulf %46, %82 : vector<1x512xf32>
    %84 = arith.addf %81, %83 : vector<1x512xf32>
    %85 = vector.broadcast %26 : f32 to vector<1x512xf32>
    %86 = arith.addf %84, %85 : vector<1x512xf32>
    %87 = arith.negf %86 : vector<1x512xf32>
    %88 = math.exp %87 : vector<1x512xf32>
    %cst_24 = arith.constant 1.000000e+00 : f32
    %89 = vector.broadcast %cst_24 : f32 to vector<1x512xf32>
    %90 = arith.addf %89, %88 : vector<1x512xf32>
    %91 = arith.divf %89, %90 : vector<1x512xf32>
    %92 = vector.broadcast %3 : f32 to vector<1x512xf32>
    %93 = arith.mulf %40, %92 : vector<1x512xf32>
    %94 = vector.broadcast %11 : f32 to vector<1x512xf32>
    %95 = arith.mulf %43, %94 : vector<1x512xf32>
    %96 = arith.addf %93, %95 : vector<1x512xf32>
    %97 = vector.broadcast %19 : f32 to vector<1x512xf32>
    %98 = arith.mulf %46, %97 : vector<1x512xf32>
    %99 = arith.addf %96, %98 : vector<1x512xf32>
    %100 = vector.broadcast %27 : f32 to vector<1x512xf32>
    %101 = arith.addf %99, %100 : vector<1x512xf32>
    %102 = arith.negf %101 : vector<1x512xf32>
    %103 = math.exp %102 : vector<1x512xf32>
    %cst_25 = arith.constant 1.000000e+00 : f32
    %104 = vector.broadcast %cst_25 : f32 to vector<1x512xf32>
    %105 = arith.addf %104, %103 : vector<1x512xf32>
    %106 = arith.divf %104, %105 : vector<1x512xf32>
    %107 = vector.broadcast %4 : f32 to vector<1x512xf32>
    %108 = arith.mulf %40, %107 : vector<1x512xf32>
    %109 = vector.broadcast %12 : f32 to vector<1x512xf32>
    %110 = arith.mulf %43, %109 : vector<1x512xf32>
    %111 = arith.addf %108, %110 : vector<1x512xf32>
    %112 = vector.broadcast %20 : f32 to vector<1x512xf32>
    %113 = arith.mulf %46, %112 : vector<1x512xf32>
    %114 = arith.addf %111, %113 : vector<1x512xf32>
    %115 = vector.broadcast %28 : f32 to vector<1x512xf32>
    %116 = arith.addf %114, %115 : vector<1x512xf32>
    %117 = arith.negf %116 : vector<1x512xf32>
    %118 = math.exp %117 : vector<1x512xf32>
    %cst_26 = arith.constant 1.000000e+00 : f32
    %119 = vector.broadcast %cst_26 : f32 to vector<1x512xf32>
    %120 = arith.addf %119, %118 : vector<1x512xf32>
    %121 = arith.divf %119, %120 : vector<1x512xf32>
    %122 = vector.broadcast %5 : f32 to vector<1x512xf32>
    %123 = arith.mulf %40, %122 : vector<1x512xf32>
    %124 = vector.broadcast %13 : f32 to vector<1x512xf32>
    %125 = arith.mulf %43, %124 : vector<1x512xf32>
    %126 = arith.addf %123, %125 : vector<1x512xf32>
    %127 = vector.broadcast %21 : f32 to vector<1x512xf32>
    %128 = arith.mulf %46, %127 : vector<1x512xf32>
    %129 = arith.addf %126, %128 : vector<1x512xf32>
    %130 = vector.broadcast %29 : f32 to vector<1x512xf32>
    %131 = arith.addf %129, %130 : vector<1x512xf32>
    %132 = arith.negf %131 : vector<1x512xf32>
    %133 = math.exp %132 : vector<1x512xf32>
    %cst_27 = arith.constant 1.000000e+00 : f32
    %134 = vector.broadcast %cst_27 : f32 to vector<1x512xf32>
    %135 = arith.addf %134, %133 : vector<1x512xf32>
    %136 = arith.divf %134, %135 : vector<1x512xf32>
    %137 = vector.broadcast %6 : f32 to vector<1x512xf32>
    %138 = arith.mulf %40, %137 : vector<1x512xf32>
    %139 = vector.broadcast %14 : f32 to vector<1x512xf32>
    %140 = arith.mulf %43, %139 : vector<1x512xf32>
    %141 = arith.addf %138, %140 : vector<1x512xf32>
    %142 = vector.broadcast %22 : f32 to vector<1x512xf32>
    %143 = arith.mulf %46, %142 : vector<1x512xf32>
    %144 = arith.addf %141, %143 : vector<1x512xf32>
    %145 = vector.broadcast %30 : f32 to vector<1x512xf32>
    %146 = arith.addf %144, %145 : vector<1x512xf32>
    %147 = arith.negf %146 : vector<1x512xf32>
    %148 = math.exp %147 : vector<1x512xf32>
    %cst_28 = arith.constant 1.000000e+00 : f32
    %149 = vector.broadcast %cst_28 : f32 to vector<1x512xf32>
    %150 = arith.addf %149, %148 : vector<1x512xf32>
    %151 = arith.divf %149, %150 : vector<1x512xf32>
    %152 = vector.broadcast %7 : f32 to vector<1x512xf32>
    %153 = arith.mulf %40, %152 : vector<1x512xf32>
    %154 = vector.broadcast %15 : f32 to vector<1x512xf32>
    %155 = arith.mulf %43, %154 : vector<1x512xf32>
    %156 = arith.addf %153, %155 : vector<1x512xf32>
    %157 = vector.broadcast %23 : f32 to vector<1x512xf32>
    %158 = arith.mulf %46, %157 : vector<1x512xf32>
    %159 = arith.addf %156, %158 : vector<1x512xf32>
    %160 = vector.broadcast %31 : f32 to vector<1x512xf32>
    %161 = arith.addf %159, %160 : vector<1x512xf32>
    %162 = arith.negf %161 : vector<1x512xf32>
    %163 = math.exp %162 : vector<1x512xf32>
    %cst_29 = arith.constant 1.000000e+00 : f32
    %164 = vector.broadcast %cst_29 : f32 to vector<1x512xf32>
    %165 = arith.addf %164, %163 : vector<1x512xf32>
    %166 = arith.divf %164, %165 : vector<1x512xf32>
    %cst_30 = arith.constant 1.600000e+01 : f32
    %167 = vector.broadcast %cst_30 : f32 to vector<1x512xf32>
    %168 = arith.mulf %61, %167 : vector<1x512xf32>
    %cst_31 = arith.constant 1.600000e+01 : f32
    %169 = vector.broadcast %cst_31 : f32 to vector<1x512xf32>
    %170 = arith.mulf %76, %169 : vector<1x512xf32>
    %cst_32 = arith.constant 1.600000e+01 : f32
    %171 = vector.broadcast %cst_32 : f32 to vector<1x512xf32>
    %172 = arith.mulf %91, %171 : vector<1x512xf32>
    %cst_33 = arith.constant 1.600000e+01 : f32
    %173 = vector.broadcast %cst_33 : f32 to vector<1x512xf32>
    %174 = arith.mulf %106, %173 : vector<1x512xf32>
    %cst_34 = arith.constant 5.000000e-01 : f32
    %175 = vector.broadcast %cst_34 : f32 to vector<1x512xf32>
    %176 = arith.mulf %175, %172 : vector<1x512xf32>
    %177 = arith.subf %168, %176 : vector<1x512xf32>
    %cst_35 = arith.constant 5.000000e-01 : f32
    %178 = vector.broadcast %cst_35 : f32 to vector<1x512xf32>
    %179 = arith.mulf %178, %174 : vector<1x512xf32>
    %180 = arith.subf %170, %179 : vector<1x512xf32>
    %cst_36 = arith.constant 5.000000e-01 : f32
    %181 = vector.broadcast %cst_36 : f32 to vector<1x512xf32>
    %182 = arith.mulf %181, %172 : vector<1x512xf32>
    %183 = arith.addf %168, %182 : vector<1x512xf32>
    %cst_37 = arith.constant 5.000000e-01 : f32
    %184 = vector.broadcast %cst_37 : f32 to vector<1x512xf32>
    %185 = arith.mulf %184, %174 : vector<1x512xf32>
    %186 = arith.addf %170, %185 : vector<1x512xf32>
    %cst_38 = arith.constant 0.000000e+00 : f32
    %187 = vector.broadcast %cst_38 : f32 to vector<1x512xf32>
    %188 = arith.cmpf ogt, %151, %136 : vector<1x512xf32>
    %189 = arith.select %188, %151, %136 : vector<1x512xi1>, vector<1x512xf32>
    %cst_39 = arith.constant 1.000000e+00 : f32
    %190 = vector.broadcast %cst_39 : f32 to vector<1x512xf32>
    %191 = arith.select %188, %190, %187 : vector<1x512xi1>, vector<1x512xf32>
    %192 = arith.cmpf ogt, %166, %189 : vector<1x512xf32>
    %193 = arith.select %192, %166, %189 : vector<1x512xi1>, vector<1x512xf32>
    %cst_40 = arith.constant 2.000000e+00 : f32
    %194 = vector.broadcast %cst_40 : f32 to vector<1x512xf32>
    %195 = arith.select %192, %194, %191 : vector<1x512xi1>, vector<1x512xf32>
    %196 = arith.mulf %121, %193 : vector<1x512xf32>
    %cst_41 = arith.constant 2.500000e-01 : f32
    %197 = vector.broadcast %cst_41 : f32 to vector<1x512xf32>
    %198 = arith.cmpf oge, %196, %197 : vector<1x512xf32>
    %cst_42 = arith.constant 0.000000e+00 : f32
    %199 = vector.broadcast %cst_42 : f32 to vector<1x512xf32>
    %200 = arith.select %198, %196, %199 : vector<1x512xi1>, vector<1x512xf32>
    %201 = arith.addf %177, %183 : vector<1x512xf32>
    %cst_43 = arith.constant 5.000000e-01 : f32
    %202 = vector.broadcast %cst_43 : f32 to vector<1x512xf32>
    %203 = arith.mulf %201, %202 : vector<1x512xf32>
    %204 = arith.addf %180, %186 : vector<1x512xf32>
    %cst_44 = arith.constant 5.000000e-01 : f32
    %205 = vector.broadcast %cst_44 : f32 to vector<1x512xf32>
    %206 = arith.mulf %204, %205 : vector<1x512xf32>
    %207 = arith.subf %183, %177 : vector<1x512xf32>
    %208 = arith.subf %186, %180 : vector<1x512xf32>
    %cst_45 = arith.constant 0.000000e+00 : f32
    %209 = vector.broadcast %cst_45 : f32 to vector<1x512xf32>
    %210 = vector.broadcast %32 : f32 to vector<1x512xf32>
    %211 = arith.mulf %177, %210 : vector<1x512xf32>
    %212 = vector.broadcast %33 : f32 to vector<1x512xf32>
    %213 = arith.mulf %180, %212 : vector<1x512xf32>
    %214 = vector.broadcast %34 : f32 to vector<1x512xf32>
    %215 = arith.mulf %183, %214 : vector<1x512xf32>
    %216 = vector.broadcast %35 : f32 to vector<1x512xf32>
    %217 = arith.mulf %186, %216 : vector<1x512xf32>
    %218 = vector.broadcast %36 : f32 to vector<1x512xf32>
    %219 = arith.mulf %200, %218 : vector<1x512xf32>
    %220 = vector.broadcast %37 : f32 to vector<1x512xf32>
    %221 = arith.mulf %195, %220 : vector<1x512xf32>
    %222 = vector.broadcast %32 : f32 to vector<1x512xf32>
    %223 = arith.mulf %203, %222 : vector<1x512xf32>
    %224 = vector.broadcast %33 : f32 to vector<1x512xf32>
    %225 = arith.mulf %206, %224 : vector<1x512xf32>
    %226 = vector.broadcast %34 : f32 to vector<1x512xf32>
    %227 = arith.mulf %207, %226 : vector<1x512xf32>
    %228 = vector.broadcast %35 : f32 to vector<1x512xf32>
    %229 = arith.mulf %208, %228 : vector<1x512xf32>
    %230 = vector.broadcast %36 : f32 to vector<1x512xf32>
    %231 = arith.mulf %200, %230 : vector<1x512xf32>
    %232 = vector.broadcast %37 : f32 to vector<1x512xf32>
    %233 = arith.mulf %195, %232 : vector<1x512xf32>
    %234 = tpu.concatenate %177, %180, %183, %186, %200, %195, %209, %209 in 0 : vector<1x512xf32>, vector<1x512xf32>, vector<1x512xf32>, vector<1x512xf32>, vector<1x512xf32>, vector<1x512xf32>, vector<1x512xf32>, vector<1x512xf32> -> vector<8x512xf32>
    %c0_46 = arith.constant 0 : index
    %c0_47 = arith.constant 0 : index
    %235 = vector.load %arg4[%c0_46, %c0_47] : memref<32x512xf32, #tpu.memory_space<vmem>>, vector<8x512xf32>
    tpu.vector_store %arg4[%c0_46, %c0_47], %234 {strides = array<i32>} : memref<32x512xf32, #tpu.memory_space<vmem>>, vector<8x512xf32>,
    %236 = tpu.concatenate %203, %206, %207, %208, %200, %195, %209, %209 in 0 : vector<1x512xf32>, vector<1x512xf32>, vector<1x512xf32>, vector<1x512xf32>, vector<1x512xf32>, vector<1x512xf32>, vector<1x512xf32>, vector<1x512xf32> -> vector<8x512xf32>
    %c8_48 = arith.constant 8 : index
    %c0_49 = arith.constant 0 : index
    %237 = vector.load %arg4[%c8_48, %c0_49] : memref<32x512xf32, #tpu.memory_space<vmem>>, vector<8x512xf32>
    tpu.vector_store %arg4[%c8_48, %c0_49], %236 {strides = array<i32>} : memref<32x512xf32, #tpu.memory_space<vmem>>, vector<8x512xf32>,
    %238 = tpu.concatenate %211, %213, %215, %217, %219, %221, %209, %209 in 0 : vector<1x512xf32>, vector<1x512xf32>, vector<1x512xf32>, vector<1x512xf32>, vector<1x512xf32>, vector<1x512xf32>, vector<1x512xf32>, vector<1x512xf32> -> vector<8x512xf32>
    %c16_50 = arith.constant 16 : index
    %c0_51 = arith.constant 0 : index
    %239 = vector.load %arg4[%c16_50, %c0_51] : memref<32x512xf32, #tpu.memory_space<vmem>>, vector<8x512xf32>
    tpu.vector_store %arg4[%c16_50, %c0_51], %238 {strides = array<i32>} : memref<32x512xf32, #tpu.memory_space<vmem>>, vector<8x512xf32>,
    %240 = tpu.concatenate %223, %225, %227, %229, %231, %233, %209, %209 in 0 : vector<1x512xf32>, vector<1x512xf32>, vector<1x512xf32>, vector<1x512xf32>, vector<1x512xf32>, vector<1x512xf32>, vector<1x512xf32>, vector<1x512xf32> -> vector<8x512xf32>
    %c24 = arith.constant 24 : index
    %c0_52 = arith.constant 0 : index
    %241 = vector.load %arg4[%c24, %c0_52] : memref<32x512xf32, #tpu.memory_space<vmem>>, vector<8x512xf32>
    tpu.vector_store %arg4[%c24, %c0_52], %240 {strides = array<i32>} : memref<32x512xf32, #tpu.memory_space<vmem>>, vector<8x512xf32>,
    return
  }
}

</mosaic_0001>

<bundles_post_ra>
// kernel: tpu_custom_call.1
= control target key start
LH: loop header
LB: loop body
LE: loop exit
PB: predicated region body
PF: predicated region fallthrough
CT: control target
= control target key end

     0   :  { %9 = vsyncpa [#allocation3], 0  ;;  %s1541_s0 = inlined_call_operand.hbm [shape: f32[3,512], index: 0, kind: input, shape index: {}]   ;;  %s1542_s1 = inlined_call_operand.hbm [shape: f32[24], index: 1, kind: input, shape index: {}]   ;;  %s1543_s2 = inlined_call_operand.vmem [shape: f32[8], index: 2, kind: input, shape index: {}]   ;;  %s1544_s3 = inlined_call_operand.vmem [shape: f32[6], index: 3, kind: input, shape index: {}]   ;;  %s1545_s4 = inlined_call_operand.hbm [shape: f32[32,512], index: 4, kind: output, shape index: {}]  }
   0x1   :  { %10 = vsyncpa [#allocation5], 0 }
   0x2   :  { %11 = vsyncpa [#allocation6], 0 }
   0x3   :  { %12 = vsyncpa [#allocation10], 0 }
   0x4   :  { %13 = vsyncpa [#allocation4], 0  ;;  %s19_s17 = sshll.u32 %s1541_s0, 4  ;;  %s902_s18 = smov [#allocation2]   ;;  %s20_s17 = int_to_ptr.hbm [resolvable:$true] %s19_s17 }
   0x5   :  { %s21_s19 = sshll.u32 %s902_s18, 4  ;;  %s30_s22 = sshll.u32 %s1542_s1, 4  ;;  %s22_s19 = int_to_ptr.vmem [resolvable:$true] %s21_s19  ;;  %s31_s22 = int_to_ptr.hbm [resolvable:$true] %s30_s22 }
   0x6   :  { %24 = dma.hbm_to_vmem [thread:$0]  %s20_s17, 256, %s22_s19, [#allocation3]  }
   0x7   :  { %s903_s23 = smov [#allocation7]   ;;  %s39_s26 = sshll.u32 %s1543_s2, 4  ;;  %s40_s26 = int_to_ptr.vmem [resolvable:$true] %s39_s26 }
   0x8   :  { %33 = dma.hbm_to_smem %s31_s22, 16, %s903_s23, [#allocation5]  }
   0x9   :  { %s48_s0 = sshll.u32 %s1544_s3, 4  ;;  %s904_s29 = smov [#allocation8]   ;;  %s49_s0 = int_to_ptr.vmem [resolvable:$true] %s48_s0 }
   0xa   :  { %42 = dma.vmem_to_smem %s40_s26, 16, %s904_s29, [#allocation6]  }
   0xb   :  { %s905_s30 = smov [#allocation9]  }
   0xc   :  { %51 = dma.vmem_to_smem %s49_s0, 16, %s905_s30, [#allocation10]  }
   0xd   :  { %892 = dma.done.wait [#allocation3], 256  }
   0xe   :  { %893 = vsyncadd [#allocation3], 4294967040 }
   0xf   :  { %894 = dma.done.wait [#allocation5], 16  }
  0x10   :  { %895 = vsyncadd [#allocation5], 4294967280 }
  0x11   :  { %896 = dma.done.wait [#allocation6], 16  }
  0x12   :  { %897 = vsyncadd [#allocation6], 4294967280 }
  0x13   :  { %898 = dma.done.wait [#allocation10], 16  }
  0x14   :  { %899 = vsyncadd [#allocation10], 4294967280 }
  0x15   :  { %68 = sfence }
  0x16   :  { %s69_s1 = sld [smem:[#allocation7]]  ;;  %v107_v0 = vld [vmem:[#allocation2] ss:$4 sm:$0xf] }
  0x17   :  { %s947_s2 = sld [smem:[#allocation7 + $0x1]]  ;;  %v110_v1 = vld [vmem:[#allocation2 + $0x1] ss:$4 sm:$0xf]  ;;  %v108_v4 = vmul.f32 0.003921569, %v107_v0 }
  0x18   :  { %s949_s5 = sld [smem:[#allocation7 + $0x2]]  ;;  %v113_v2 = vld [vmem:[#allocation2 + $0x2] ss:$4 sm:$0xf]  ;;  %v111_v5 = vmul.f32 0.003921569, %v110_v1 }
  0x19   :  { %s951_s3 = sld [smem:[#allocation7 + $0x3]]  ;;  %v977_v7 = vmul.f32 0.003921569, %v113_v2 }
  0x1a   :  { %s953_s6 = sld [smem:[#allocation7 + $0x4]] }
  0x1b   :  { %s955_s7 = sld [smem:[#allocation7 + $0x5]] }
  0x1c   :  { %s957_s8 = sld [smem:[#allocation7 + $0x6]]  ;;  %v115_v3 = vstv %s69_s1 }
  0x1d   :  { %s959_s9 = sld [smem:[#allocation7 + $0x7]]  ;;  %v144_v8 = vstv %s947_s2  ;;  %v116_v11 = vmul.f32 %v115_v3, %v108_v4 }
  0x1e   :  { %s732_s10 = sld [smem:[#allocation7 + $0x8]]  ;;  %v173_v9 = vstv %s949_s5  ;;  %v145_v19 = vmul.f32 %v144_v8, %v108_v4 }
  0x1f   :  { %s961_s11 = sld [smem:[#allocation7 + $0x9]]  ;;  %v202_v10 = vstv %s951_s3  ;;  %v174_v20 = vmul.f32 %v173_v9, %v108_v4 }
  0x20   :  { %s963_s12 = sld [smem:[#allocation7 + $0xa]]  ;;  %v231_v13 = vstv %s953_s6  ;;  %v203_v21 = vmul.f32 %v202_v10, %v108_v4 }
  0x21   :  { %s965_s13 = sld [smem:[#allocation7 + $0xb]]  ;;  %v260_v14 = vstv %s955_s7  ;;  %v232_v24 = vmul.f32 %v231_v13, %v108_v4 }
  0x22   :  { %s967_s14 = sld [smem:[#allocation7 + $0xc]]  ;;  %v289_v17 = vstv %s957_s8  ;;  %v261_v26 = vmul.f32 %v260_v14, %v108_v4 }
  0x23   :  { %s969_s15 = sld [smem:[#allocation7 + $0xd]]  ;;  %v318_v18 = vstv %s959_s9  ;;  %v290_v29 = vmul.f32 %v289_v17, %v108_v4 }
  0x24   :  { %s971_s16 = sld [smem:[#allocation7 + $0xe]]  ;;  %v117_v6 = vstv %s732_s10  ;;  %v319_v30 = vmul.f32 %v318_v18, %v108_v4  ;;  %s907_s10 = smov [#allocation11]  }
  0x25   :  { %s973_s17 = sld [smem:[#allocation7 + $0xf]]  ;;  %v146_v12 = vstv %s961_s11  ;;  %v118_v15 = vmul.f32 %v117_v6, %v111_v5  ;;  %s707_s11 = sshll.u32 %s907_s10, 4  ;;  %s708_s11 = int_to_ptr.vmem [resolvable:$true] %s707_s11 }
  0x26   :  { %s975_s18 = sld [smem:[#allocation7 + $0x10]]  ;;  %v175_v16 = vstv %s963_s12  ;;  %v147_v23 = vmul.f32 %v146_v12, %v111_v5 }
  0x27   :  { %s982_s19 = sld [smem:[#allocation7 + $0x11]]  ;;  %v204_v22 = vstv %s965_s13  ;;  %v176_v27 = vmul.f32 %v175_v16, %v111_v5  ;;  %v119_v31 = vadd.f32 %v118_v15, %v116_v11 }
  0x28   :  { %s987_s20 = sld [smem:[#allocation7 + $0x12]]  ;;  %v233_v25 = vstv %s967_s14  ;;  %v205_v33 = vmul.f32 %v204_v22, %v111_v5  ;;  %v148_v39 = vadd.f32 %v147_v23, %v145_v19  ;;  %s709_s14 = sshll.u32 %s1545_s4, 4  ;;  %s710_s14 = int_to_ptr.hbm [resolvable:$true] %s709_s14 }
  0x29   :  { %s992_s21 = sld [smem:[#allocation7 + $0x13]]  ;;  %v262_v28 = vstv %s969_s15  ;;  %v234_v37 = vmul.f32 %v233_v25, %v111_v5  ;;  %v177_v43 = vadd.f32 %v176_v27, %v174_v20  ;;  %s908_s4 = smov 512  }
  0x2a   :  { %s995_s22 = sld [smem:[#allocation7 + $0x14]]  ;;  %v291_v34 = vstv %s971_s16  ;;  %v263_v42 = vmul.f32 %v262_v28, %v111_v5  ;;  %v206_v47 = vadd.f32 %v205_v33, %v203_v21  ;;  %s909_s15 = smov 32  }
  0x2b   :  { %s998_s23 = sld [smem:[#allocation7 + $0x15]]  ;;  %v320_v38 = vstv %s973_s17  ;;  %v292_v46 = vmul.f32 %v291_v34, %v111_v5  ;;  %v235_v52 = vadd.f32 %v234_v37, %v232_v24 }
  0x2c   :  { %s1001_s24 = sld [smem:[#allocation7 + $0x16]]  ;;  %v120_v32 = vstv %s975_s18  ;;  %v321_v50 = vmul.f32 %v320_v38, %v111_v5  ;;  %v264_v56 = vadd.f32 %v263_v42, %v261_v26 }
  0x2d   :  { %s1005_s25 = sld [smem:[#allocation7 + $0x17]]  ;;  %v121_v35 = vmul.f32 %v120_v32, %v977_v7  ;;  %v149_v36 = vstv %s982_s19  ;;  %v293_v60 = vadd.f32 %v292_v46, %v290_v29 }
  0x2e   :  { %s1010_s26 = sld [smem:[#allocation8]]  ;;  %v150_v40 = vmul.f32 %v149_v36, %v977_v7  ;;  %v178_v41 = vstv %s987_s20  ;;  %v322_v1 = vadd.f32 %v321_v50, %v319_v30 }
  0x2f   :  { %s1014_s27 = sld [smem:[#allocation8 + $0x1]]  ;;  %v179_v44 = vmul.f32 %v178_v41, %v977_v7  ;;  %v207_v45 = vstv %s992_s21  ;;  %v122_v51 = vadd.f32 %v121_v35, %v119_v31 }
  0x30   :  { %s1018_s28 = sld [smem:[#allocation8 + $0x2]]  ;;  %v208_v48 = vmul.f32 %v207_v45, %v977_v7  ;;  %v236_v49 = vstv %s995_s22  ;;  %v151_v55 = vadd.f32 %v150_v40, %v148_v39 }
  0x31   :  { %s1022_s0 = sld [smem:[#allocation8 + $0x3]]  ;;  %v237_v53 = vmul.f32 %v236_v49, %v977_v7  ;;  %v265_v54 = vstv %s998_s23  ;;  %v180_v59 = vadd.f32 %v179_v44, %v177_v43 }
  0x32   :  { %s1026_s29 = sld [smem:[#allocation8 + $0x4]]  ;;  %v266_v57 = vmul.f32 %v265_v54, %v977_v7  ;;  %v294_v58 = vstv %s1001_s24  ;;  %v209_v0 = vadd.f32 %v208_v48, %v206_v47 }
  0x33   :  { %s1030_s30 = sld [smem:[#allocation8 + $0x5]]  ;;  %v295_v61 = vmul.f32 %v294_v58, %v977_v7  ;;  %v323_v62 = vstv %s1005_s25  ;;  %v238_v5 = vadd.f32 %v237_v53, %v235_v52 }
  0x34   :  { %s1034_s1 = sld [smem:[#allocation8 + $0x6]]  ;;  %v123_v63 = vstv %s1010_s26  ;;  %v324_v2 = vmul.f32 %v323_v62, %v977_v7  ;;  %v267_v9 = vadd.f32 %v266_v57, %v264_v56 }
  0x35   :  { %s754_s2 = sld [smem:[#allocation8 + $0x7]]  ;;  %v124_v3 = vadd.f32 %v123_v63, %v122_v51  ;;  %v152_v4 = vstv %s1014_s27  ;;  %v296_v13 = vadd.f32 %v295_v61, %v293_v60 }
  0x36   :  { %v153_v6 = vadd.f32 %v152_v4, %v151_v55  ;;  %v181_v8 = vstv %s1018_s28  ;;  %v325_v17 = vadd.f32 %v324_v2, %v322_v1  ;;  %s1339_s5 = sld [smem:[#allocation9]] }
  0x37   :  { %v760_v10 = vmul.f32 -1.442695, %v124_v3  ;;  %v182_v11 = vadd.f32 %v181_v8, %v180_v59  ;;  %v210_v12 = vstv %s1022_s0  ;;  %s1345_s3 = sld [smem:[#allocation9 + $0x1]] }
  0x38   :  { %v761_v14 = vmul.f32 -1.442695, %v153_v6  ;;  %v211_v15 = vadd.f32 %v210_v12, %v209_v0  ;;  %v239_v16 = vstv %s1026_s29  ;;  %s1359_s6 = sld [smem:[#allocation9 + $0x2]] }
  0x39   :  { %776 = vpow2.f32 %v760_v10  ;;  %v762_v18 = vmul.f32 -1.442695, %v182_v11  ;;  %v240_v7 = vadd.f32 %v239_v16, %v238_v5  ;;  %v268_v19 = vstv %s1030_s30  ;;  %s1365_s7 = sld [smem:[#allocation9 + $0x3]] }
  0x3a   :  { %778 = vpow2.f32 %v761_v14  ;;  %v763_v20 = vmul.f32 -1.442695, %v211_v15  ;;  %v269_v21 = vadd.f32 %v268_v19, %v267_v9  ;;  %v297_v22 = vstv %s1034_s1  ;;  %s1371_s8 = sld [smem:[#allocation9 + $0x4]] }
  0x3b   :  { %780 = vpow2.f32 %v762_v18  ;;  %v764_v23 = vmul.f32 -1.442695, %v240_v7  ;;  %v326_v24 = vstv %s754_s2  ;;  %v298_v26 = vadd.f32 %v297_v22, %v296_v13  ;;  %s1377_s9 = sld [smem:[#allocation9 + $0x5]] }
  0x3c   :  { %782 = vpow2.f32 %v763_v20  ;;  %v765_v25 = vmul.f32 -1.442695, %v269_v21  ;;  %v327_v27 = vadd.f32 %v326_v24, %v325_v17 }
  0x3d   :  { %784 = vpow2.f32 %v764_v23  ;;  %v766_v31 = vmul.f32 -1.442695, %v298_v26 }
  0x3e   :  { %786 = vpow2.f32 %v765_v25  ;;  %v767_v34 = vmul.f32 -1.442695, %v327_v27 }
  0x3f   :  { %v777_v28 = vpop.eup %776 }
  0x40   :  { %v779_v29 = vpop.eup %778  ;;  %v1044_v30 = vadd.f32 1.0, %v777_v28 }
  0x41   :  { %v781_v32 = vpop.eup %780  ;;  %v1046_v33 = vadd.f32 1.0, %v779_v29 }
  0x42   :  { %v783_v35 = vpop.eup %782  ;;  %788 = vrcp.f32 %v1044_v30  ;;  %v1050_v38 = vadd.f32 1.0, %v781_v32  ;;  %v140_v40 = vand.u32 2147483648, %v1044_v30  ;;  %vm134_vm0 = vweird.f32 %v1044_v30 }
  0x43   :  { %v785_v36 = vpop.eup %784  ;;  %790 = vrcp.f32 %v1046_v33  ;;  %v1052_v39 = vadd.f32 1.0, %v783_v35  ;;  %v169_v41 = vand.u32 2147483648, %v1046_v33  ;;  %v138_v43 = vand.u32 2147483647, %v1044_v30 }
  0x44   :  { %v787_v37 = vpop.eup %786  ;;  %792 = vpow2.f32 %v766_v31  ;;  %v1056_v42 = vadd.f32 1.0, %v785_v36  ;;  %v198_v44 = vand.u32 2147483648, %v1050_v38  ;;  %vm163_vm1 = vweird.f32 %v1046_v33 }
  0x45   :  { %794 = vpow2.f32 %v767_v34  ;;  %v196_v45 = vand.u32 2147483647, %v1050_v38  ;;  %v1065_v46 = vadd.f32 1.0, %v787_v37  ;;  %v167_v48 = vand.u32 2147483647, %v1046_v33 }
  0x46   :  { %796 = vrcp.f32 %v1050_v38  ;;  %v225_v49 = vand.u32 2147483647, %v1052_v39  ;;  %v227_v50 = vand.u32 2147483648, %v1052_v39  ;;  %v1077_v53 = vor.u32 1.1754944e-38, %v140_v40 }
  0x47   :  { %798 = vrcp.f32 %v1052_v39  ;;  %v1079_v54 = vor.u32 1.1754944e-38, %v169_v41  ;;  %vm192_vm2 = vweird.f32 %v1050_v38  ;;  %v1084_v57 = vor.u32 1.1754944e-38, %v198_v44 }
  0x48   :  { %v1067_v47 = vpop.eup %788  ;;  %800 = vrcp.f32 %v1056_v42  ;;  %vm221_vm3 = vweird.f32 %v1052_v39  ;;  %v256_v58 = vand.u32 2147483648, %v1056_v42  ;;  %vm1089_vm5 = vcmp.eq.f32.partialorder %v196_v45, 8.507059e+37 }
  0x49   :  { %v1073_v51 = vpop.eup %790  ;;  %v130_v52 = vmul.f32 %v1067_v47, %v1044_v30  ;;  %vm135_vm4 = vweird.f32 %v1067_v47  ;;  %vm250_vm6 = vweird.f32 %v1056_v42  ;;  %802 = vrcp.f32 %v1065_v46 }
  0x4a   :  { %v793_v55 = vpop.eup %792  ;;  %v159_v56 = vmul.f32 %v1073_v51, %v1046_v33  ;;  %vm1095_vm7 = vcmp.eq.f32.partialorder %v138_v43, 8.507059e+37  ;;  %vm164_vm8 = vweird.f32 %v1073_v51  ;;  %vm1100_vm9 = vcmp.eq.f32.partialorder %v167_v48, 8.507059e+37  ;;  %vm1123_vm12 = vmor %vm134_vm0, %vm135_vm4 }
  0x4b   :  { %v795_v59 = vpop.eup %794  ;;  %v131_v60 = vsub.f32 1.0, %v130_v52  ;;  %vm1104_vm10 = vcmp.eq.f32.partialorder %v225_v49, 8.507059e+37  ;;  %v228_v3 = vor.u32 1.1754944e-38, %v227_v50  ;;  %v254_v4 = vand.u32 2147483647, %v1056_v42  ;;  %vm1134_vm14 = vmor %vm163_vm1, %vm164_vm8 }
  0x4c   :  { %v797_v62 = vpop.eup %796  ;;  %v160_v0 = vsub.f32 1.0, %v159_v56  ;;  %v283_v9 = vand.u32 2147483647, %v1065_v46  ;;  %v285_v10 = vand.u32 2147483648, %v1065_v46  ;;  %v257_v14 = vor.u32 1.1754944e-38, %v256_v58 }
  0x4d   :  { %v799_v5 = vpop.eup %798  ;;  %v132_v6 = vmul.f32 %v1067_v47, %v131_v60  ;;  %v188_v8 = vmul.f32 %v797_v62, %v1050_v38  ;;  %vm279_vm11 = vweird.f32 %v1065_v46  ;;  %vm193_vm13 = vweird.f32 %v797_v62 }
  0x4e   :  { %v1113_v11 = vpop.eup %800  ;;  %v161_v12 = vmul.f32 %v1073_v51, %v160_v0  ;;  %v217_v13 = vmul.f32 %v799_v5, %v1052_v39  ;;  %vm222_vm15 = vweird.f32 %v799_v5  ;;  %vm1138_vm0 = vcmp.eq.f32.partialorder %v254_v4, 8.507059e+37  ;;  %vm1150_vm1 = vmor %vm192_vm2, %vm193_vm13 }
  0x4f   :  { %v133_v15 = vadd.f32 %v1067_v47, %v132_v6  ;;  %v189_v17 = vsub.f32 1.0, %v188_v8  ;;  %v246_v18 = vmul.f32 %v1113_v11, %v1056_v42  ;;  %v1142_v22 = vadd.f32 1.0, %v793_v55  ;;  %v803_v23 = vpop.eup %802  ;;  %vm1167_vm2 = vmor %vm221_vm3, %vm222_vm15 }
  0x50   :  { %v162_v7 = vadd.f32 %v1073_v51, %v161_v12  ;;  %v218_v20 = vsub.f32 1.0, %v217_v13  ;;  %vm1144_vm4 = vcmp.eq.f32.partialorder %v283_v9, 8.507059e+37  ;;  %v286_v27 = vor.u32 1.1754944e-38, %v285_v10 }
  0x51   :  { %v190_v24 = vmul.f32 %v797_v62, %v189_v17  ;;  %v247_v25 = vsub.f32 1.0, %v246_v18  ;;  %vm251_vm8 = vweird.f32 %v1113_v11  ;;  %v275_v30 = vmul.f32 %v803_v23, %v1065_v46 }
  0x52   :  { %v219_v29 = vmul.f32 %v799_v5, %v218_v20  ;;  %v1156_v31 = vadd.f32 1.0, %v795_v59  ;;  %v137_v32 = vsel %vm1123_vm12, %v1067_v47, %v133_v15  ;;  %v166_v33 = vsel %vm1134_vm14, %v1073_v51, %v162_v7  ;;  %vm1178_vm12 = vmor %vm250_vm6, %vm251_vm8 }
  0x53   :  { %v191_v34 = vadd.f32 %v797_v62, %v190_v24  ;;  %v248_v36 = vmul.f32 %v1113_v11, %v247_v25  ;;  %v276_v38 = vsub.f32 1.0, %v275_v30  ;;  %vm280_vm13 = vweird.f32 %v803_v23 }
  0x54   :  { %v220_v37 = vadd.f32 %v799_v5, %v219_v29  ;;  %804 = vrcp.f32 %v1142_v22  ;;  %v312_v43 = vand.u32 2147483647, %v1142_v22  ;;  %v314_v44 = vand.u32 2147483648, %v1142_v22  ;;  %vm1200_vm3 = vmor %vm279_vm11, %vm280_vm13 }
  0x55   :  { %v195_v40 = vsel %vm1150_vm1, %v797_v62, %v191_v34  ;;  %v249_v41 = vadd.f32 %v1113_v11, %v248_v36  ;;  %v277_v48 = vmul.f32 %v803_v23, %v276_v38  ;;  %806 = vrcp.f32 %v1156_v31 }
  0x56   :  { %v200_v45 = vsel %vm1089_vm5, %v1084_v57, %v195_v40  ;;  %v224_v47 = vsel %vm1167_vm2, %v799_v5, %v220_v37  ;;  %v142_v42 = vsel %vm1095_vm7, %v1077_v53, %v137_v32  ;;  %v171_v49 = vsel %vm1100_vm9, %v1079_v54, %v166_v33 }
  0x57   :  { %v229_v50 = vsel %vm1104_vm10, %v228_v3, %v224_v47  ;;  %v253_v52 = vsel %vm1178_vm12, %v1113_v11, %v249_v41  ;;  %v278_v55 = vadd.f32 %v803_v23, %v277_v48  ;;  %vm308_vm5 = vweird.f32 %v1142_v22 }
  0x58   :  { %v341_v53 = vand.u32 2147483647, %v1156_v31  ;;  %vm1209_vm6 = vcmp.eq.f32.partialorder %v312_v43, 8.507059e+37  ;;  %v315_v56 = vor.u32 1.1754944e-38, %v314_v44  ;;  %v343_v46 = vand.u32 2147483648, %v1156_v31 }
  0x59   :  { %v349_v57 = vmul.f32 16.0, %v200_v45  ;;  %v282_v59 = vsel %vm1200_vm3, %v803_v23, %v278_v55  ;;  %v347_v60 = vmul.f32 16.0, %v142_v42  ;;  %v348_v61 = vmul.f32 16.0, %v171_v49 }
  0x5a   :  { %v805_v58 = vpop.eup %804  ;;  %v350_v62 = vmul.f32 16.0, %v229_v50  ;;  %v1218_v63 = vsel %vm1138_vm0, %v257_v14, %v253_v52  ;;  %vm337_vm7 = vweird.f32 %v1156_v31  ;;  %vm1222_vm9 = vcmp.eq.f32.partialorder %v341_v53, 8.507059e+37 }
  0x5b   :  { %v304_v0 = vmul.f32 %v805_v58, %v1142_v22  ;;  %v807_v2 = vpop.eup %806  ;;  %v287_v3 = vsel %vm1144_vm4, %v286_v27, %v282_v59  ;;  %v351_v4 = vmul.f32 0.5, %v349_v57  ;;  %vm442_vm10 = vcmask 1040384  }
  0x5c   :  { %v353_v5 = vmul.f32 0.5, %v350_v62  ;;  %vm309_vm11 = vweird.f32 %v805_v58  ;;  %v333_v8 = vmul.f32 %v807_v2, %v1156_v31  ;;  %v344_v9 = vor.u32 1.1754944e-38, %v343_v46 }
  0x5d   :  { %v305_v6 = vsub.f32 1.0, %v304_v0  ;;  %v1229_v10 = vsub.f32 %v347_v60, %v351_v4  ;;  %v1233_v12 = vadd.f32 %v351_v4, %v347_v60  ;;  %vm338_vm14 = vweird.f32 %v807_v2  ;;  %vm1239_vm0 = vmor %vm308_vm5, %vm309_vm11 }
  0x5e   :  { %v1231_v11 = vsub.f32 %v348_v61, %v353_v5  ;;  %v1235_v13 = vadd.f32 %v353_v5, %v348_v61  ;;  %v334_v15 = vsub.f32 1.0, %v333_v8  ;;  %vm447_vm15 = vcmask 1041408   ;;  %vm1250_vm1 = vmor %vm337_vm7, %vm338_vm14 }
  0x5f   :  { %v306_v14 = vmul.f32 %v805_v58, %v305_v6  ;;  %v389_v17 = vperm.slane %v1229_v10, 0  ;;  %v407_v7 = vperm.slane %v1233_v12, 0  ;;  %vm452_vm4 = vcmask 1042432  }
  0x60   :  { %v398_v18 = vperm.slane %v1231_v11, 0  ;;  %v416_v19 = vperm.slane %v1235_v13, 0  ;;  %v335_v21 = vmul.f32 %v807_v2, %v334_v15  ;;  %v390_v23 = vperm.slane %v1229_v10, 1 }
  0x61   :  { %v307_v20 = vadd.f32 %v805_v58, %v306_v14  ;;  %v399_v25 = vperm.slane %v1231_v11, 1  ;;  %v408_v26 = vperm.slane %v1233_v12, 1  ;;  %v417_v27 = vperm.slane %v1235_v13, 1 }
  0x62   :  { %v443_v24 = vsel %vm442_vm10, %v389_v17, %v398_v18  ;;  %v336_v29 = vadd.f32 %v807_v2, %v335_v21  ;;  %v391_v31 = vperm.slane %v1229_v10, 2  ;;  %vm457_vm8 = vcmask 1043456  }
  0x63   :  { %v311_v28 = vsel %vm1239_vm0, %v805_v58, %v307_v20  ;;  %v448_v30 = vsel %vm447_vm15, %v443_v24, %v407_v7  ;;  %v444_v34 = vsel %vm442_vm10, %v390_v23, %v399_v25  ;;  %v400_v35 = vperm.slane %v1231_v11, 2 }
  0x64   :  { %v316_v32 = vsel %vm1209_vm6, %v315_v56, %v311_v28  ;;  %v453_v33 = vsel %vm452_vm4, %v448_v30, %v416_v19  ;;  %v340_v36 = vsel %vm1250_vm1, %v807_v2, %v336_v29  ;;  %vm462_vm13 = vcmask 1044480  }
  0x65   :  { %vm357_vm2 = vcmp.gt.f32.partialorder %v316_v32, %v287_v3  ;;  %v449_v37 = vsel %vm447_vm15, %v444_v34, %v408_v26  ;;  %v409_v38 = vperm.slane %v1233_v12, 2  ;;  %v345_v40 = vsel %vm1222_vm9, %v344_v9, %v340_v36 }
  0x66   :  { %v358_v41 = vsel %vm357_vm2, %v316_v32, %v287_v3  ;;  %v906_v39 = vmov 0.0   ;;  %vm467_vm12 = vcmask 1045504   ;;  %v454_v44 = vsel %vm452_vm4, %v449_v37, %v417_v27 }
  0x67   :  { %v359_v43 = vsel %vm357_vm2, 1.0, %v906_v39  ;;  %vm360_vm3 = vcmp.gt.f32.partialorder %v345_v40, %v358_v41  ;;  %vm472_vm5 = vcmask 1046528   ;;  %v418_v45 = vperm.slane %v1235_v13, 2 }
  0x68   :  { %v445_v47 = vsel %vm442_vm10, %v391_v31, %v400_v35  ;;  %v392_v48 = vperm.slane %v1229_v10, 3  ;;  %v361_v42 = vsel %vm360_vm3, %v345_v40, %v358_v41  ;;  %v1277_v49 = vsel %vm360_vm3, 2.0, %v359_v43 }
  0x69   :  { %v450_v50 = vsel %vm447_vm15, %v445_v47, %v409_v38  ;;  %v401_v51 = vperm.slane %v1231_v11, 3  ;;  %v363_v52 = vmul.f32 %v361_v42, %v1218_v63  ;;  %v434_v55 = vperm.slane %v1277_v49, 0 }
  0x6a   :  { %v435_v53 = vperm.slane %v1277_v49, 1  ;;  %v436_v54 = vperm.slane %v1277_v49, 2  ;;  %v455_v56 = vsel %vm452_vm4, %v450_v50, %v418_v45  ;;  %v410_v46 = vperm.slane %v1233_v12, 3 }
  0x6b   :  { %v419_v57 = vperm.slane %v1235_v13, 3  ;;  %v437_v58 = vperm.slane %v1277_v49, 3  ;;  %vm364_vm6 = vcmp.ge.f32.partialorder %v363_v52, 0.25  ;;  %v446_v59 = vsel %vm442_vm10, %v392_v48, %v401_v51 }
  0x6c   :  { %v366_v60 = vadd.f32 %v1233_v12, %v1229_v10  ;;  %v368_v61 = vadd.f32 %v1235_v13, %v1231_v11  ;;  %v1294_v62 = vsel %vm364_vm6, %v363_v52, 0.0  ;;  %v451_v63 = vsel %vm447_vm15, %v446_v59, %v410_v46 }
  0x6d   :  { %v1299_v0 = vsub.f32 %v1233_v12, %v1229_v10  ;;  %v1303_v1 = vsub.f32 %v1235_v13, %v1231_v11  ;;  %v425_v2 = vperm.slane %v1294_v62, 0  ;;  %v426_v3 = vperm.slane %v1294_v62, 1 }
  0x6e   :  { %v427_v4 = vperm.slane %v1294_v62, 2  ;;  %v428_v5 = vperm.slane %v1294_v62, 3  ;;  %v456_v6 = vsel %vm452_vm4, %v451_v63, %v419_v57  ;;  %v1310_v8 = vmul.f32 0.5, %v366_v60 }
  0x6f   :  { %v1312_v9 = vmul.f32 0.5, %v368_v61  ;;  %v500_v14 = vperm.slane %v1299_v0, 0  ;;  %v458_v15 = vsel %vm457_vm8, %v453_v33, %v425_v2  ;;  %v459_v16 = vsel %vm457_vm8, %v454_v44, %v426_v3 }
  0x70   :  { %v460_v17 = vsel %vm457_vm8, %v455_v56, %v427_v4  ;;  %v461_v18 = vsel %vm457_vm8, %v456_v6, %v428_v5  ;;  %v463_v7 = vsel %vm462_vm13, %v458_v15, %v434_v55  ;;  %v464_v19 = vsel %vm462_vm13, %v459_v16, %v435_v53 }
  0x71   :  { %v465_v20 = vsel %vm462_vm13, %v460_v17, %v436_v54  ;;  %v466_v21 = vsel %vm462_vm13, %v461_v18, %v437_v58  ;;  %v468_v23 = vsel %vm467_vm12, %v463_v7, 0.0  ;;  %v469_v22 = vsel %vm467_vm12, %v464_v19, 0.0 }
  0x72   :  { %v470_v24 = vsel %vm467_vm12, %v465_v20, 0.0  ;;  %v471_v25 = vsel %vm467_vm12, %v466_v21, 0.0  ;;  %v473_v26 = vsel %vm472_vm5, %v468_v23, 0.0  ;;  %v474_v27 = vsel %vm472_vm5, %v469_v22, 0.0 }
  0x73   :  { %v475_v28 = vsel %vm472_vm5, %v470_v24, 0.0  ;;  %v476_v29 = vsel %vm472_vm5, %v471_v25, 0.0  ;;  %477 = vst [vmem:[#allocation11] sm:$0xff] %v473_v26  ;;  %v482_v30 = vperm.slane %v1310_v8, 0  ;;  %v491_v31 = vperm.slane %v1312_v9, 0 }
  0x74   :  { %v509_v32 = vperm.slane %v1303_v1, 0  ;;  %v483_v33 = vperm.slane %v1310_v8, 1  ;;  %478 = vst [vmem:[#allocation11 + $0x8] sm:$0xff] %v474_v27  ;;  %v492_v34 = vperm.slane %v1312_v9, 1  ;;  %v501_v35 = vperm.slane %v1299_v0, 1 }
  0x75   :  { %v510_v36 = vperm.slane %v1303_v1, 1  ;;  %v484_v37 = vperm.slane %v1310_v8, 2  ;;  %479 = vst [vmem:[#allocation11 + $0x10] sm:$0xff] %v475_v28  ;;  %v517_v38 = vsel %vm442_vm10, %v482_v30, %v491_v31  ;;  %v493_v40 = vperm.slane %v1312_v9, 2 }
  0x76   :  { %v502_v41 = vperm.slane %v1299_v0, 2  ;;  %v511_v39 = vperm.slane %v1303_v1, 2  ;;  %480 = vst [vmem:[#allocation11 + $0x18] sm:$0xff] %v476_v29  ;;  %v521_v43 = vsel %vm447_vm15, %v517_v38, %v500_v14  ;;  %v518_v44 = vsel %vm442_vm10, %v483_v33, %v492_v34 }
  0x77   :  { %v485_v45 = vperm.slane %v1310_v8, 3  ;;  %v494_v47 = vperm.slane %v1312_v9, 3  ;;  %v525_v48 = vsel %vm452_vm4, %v521_v43, %v509_v32  ;;  %v522_v42 = vsel %vm447_vm15, %v518_v44, %v501_v35 }
  0x78   :  { %v519_v50 = vsel %vm442_vm10, %v484_v37, %v493_v40  ;;  %v503_v51 = vperm.slane %v1299_v0, 3  ;;  %v529_v52 = vsel %vm457_vm8, %v525_v48, %v425_v2  ;;  %v526_v56 = vsel %vm452_vm4, %v522_v42, %v510_v36 }
  0x79   :  { %v523_v46 = vsel %vm447_vm15, %v519_v50, %v502_v41  ;;  %v512_v57 = vperm.slane %v1303_v1, 3  ;;  %v533_v59 = vsel %vm462_vm13, %v529_v52, %v434_v55  ;;  %v530_v60 = vsel %vm457_vm8, %v526_v56, %v426_v3 }
  0x7a   :  { %v527_v61 = vsel %vm452_vm4, %v523_v46, %v511_v39  ;;  %v520_v63 = vsel %vm442_vm10, %v485_v45, %v494_v47  ;;  %v537_v2 = vsel %vm467_vm12, %v533_v59, 0.0  ;;  %v534_v6 = vsel %vm462_vm13, %v530_v60, %v435_v53 }
  0x7b   :  { %v531_v14 = vsel %vm457_vm8, %v527_v61, %v427_v4  ;;  %v524_v55 = vsel %vm447_vm15, %v520_v63, %v503_v51  ;;  %v541_v3 = vsel %vm472_vm5, %v537_v2, 0.0  ;;  %v538_v15 = vsel %vm467_vm12, %v534_v6, 0.0 }
  0x7c   :  { %v535_v16 = vsel %vm462_vm13, %v531_v14, %v436_v54  ;;  %v528_v53 = vsel %vm452_vm4, %v524_v55, %v512_v57  ;;  %545 = vst [vmem:[#allocation11 + $0x20] sm:$0xff] %v541_v3  ;;  %v542_v17 = vsel %vm472_vm5, %v538_v15, 0.0  ;;  %v372_v7 = vstv %s1339_s5 }
  0x7d   :  { %v539_v4 = vsel %vm467_vm12, %v535_v16, 0.0  ;;  %v532_v18 = vsel %vm457_vm8, %v528_v53, %v428_v5  ;;  %546 = vst [vmem:[#allocation11 + $0x28] sm:$0xff] %v542_v17  ;;  %v373_v20 = vmul.f32 %v372_v7, %v1229_v10  ;;  %v374_v21 = vstv %s1345_s3 }
  0x7e   :  { %v543_v19 = vsel %vm472_vm5, %v539_v4, 0.0  ;;  %v536_v54 = vsel %vm462_vm13, %v532_v18, %v437_v58  ;;  %v375_v22 = vmul.f32 %v374_v21, %v1231_v11  ;;  %v376_v5 = vstv %s1359_s6 }
  0x7f   :  { %547 = vst [vmem:[#allocation11 + $0x30] sm:$0xff] %v543_v19  ;;  %v540_v23 = vsel %vm467_vm12, %v536_v54, 0.0  ;;  %v378_v24 = vstv %s1365_s7  ;;  %v377_v26 = vmul.f32 %v376_v5, %v1233_v12  ;;  %v380_v58 = vstv %s1371_s8 }
  0x80   :  { %v544_v25 = vsel %vm472_vm5, %v540_v23, 0.0  ;;  %v379_v27 = vmul.f32 %v378_v24, %v1235_v13  ;;  %v1426_v10 = vmul.f32 %v380_v58, %v1294_v62  ;;  %v382_v28 = vstv %s1377_s9 }
  0x81   :  { %548 = vst [vmem:[#allocation11 + $0x38] sm:$0xff] %v544_v25  ;;  %v550_v29 = vperm.slane %v373_v20, 0  ;;  %v559_v30 = vperm.slane %v375_v22, 0  ;;  %v1430_v31 = vmul.f32 %v382_v28, %v1277_v49  ;;  %v568_v11 = vperm.slane %v377_v26, 0 }
  0x82   :  { %v577_v32 = vperm.slane %v379_v27, 0  ;;  %v551_v33 = vperm.slane %v373_v20, 1  ;;  %v586_v34 = vperm.slane %v1426_v10, 0  ;;  %v560_v35 = vperm.slane %v375_v22, 1 }
  0x83   :  { %v603_v12 = vsel %vm442_vm10, %v550_v29, %v559_v30  ;;  %v569_v13 = vperm.slane %v377_v26, 1  ;;  %v595_v36 = vperm.slane %v1430_v31, 0  ;;  %v578_v37 = vperm.slane %v379_v27, 1 }
  0x84   :  { %v607_v62 = vsel %vm447_vm15, %v603_v12, %v568_v11  ;;  %v587_v38 = vperm.slane %v1426_v10, 1  ;;  %v596_v49 = vperm.slane %v1430_v31, 1  ;;  %v604_v41 = vsel %vm442_vm10, %v551_v33, %v560_v35 }
  0x85   :  { %v611_v40 = vsel %vm452_vm4, %v607_v62, %v577_v32  ;;  %v552_v39 = vperm.slane %v373_v20, 2  ;;  %v608_v44 = vsel %vm447_vm15, %v604_v41, %v569_v13  ;;  %v561_v45 = vperm.slane %v375_v22, 2 }
  0x86   :  { %v615_v43 = vsel %vm457_vm8, %v611_v40, %v586_v34  ;;  %v570_v47 = vperm.slane %v377_v26, 2  ;;  %v612_v42 = vsel %vm452_vm4, %v608_v44, %v578_v37  ;;  %v579_v50 = vperm.slane %v379_v27, 2 }
  0x87   :  { %v619_v48 = vsel %vm462_vm13, %v615_v43, %v595_v36  ;;  %v588_v51 = vperm.slane %v1426_v10, 2  ;;  %v616_v56 = vsel %vm457_vm8, %v612_v42, %v587_v38  ;;  %v597_v46 = vperm.slane %v1430_v31, 2 }
  0x88   :  { %v623_v52 = vsel %vm467_vm12, %v619_v48, 0.0  ;;  %v605_v57 = vsel %vm442_vm10, %v552_v39, %v561_v45  ;;  %v620_v60 = vsel %vm462_vm13, %v616_v56, %v596_v49  ;;  %v553_v63 = vperm.slane %v373_v20, 3 }
  0x89   :  { %v627_v59 = vsel %vm472_vm5, %v623_v52, 0.0  ;;  %v609_v61 = vsel %vm447_vm15, %v605_v57, %v570_v47  ;;  %v624_v2 = vsel %vm467_vm12, %v620_v60, 0.0  ;;  %v562_v14 = vperm.slane %v375_v22, 3 }
  0x8a   :  { %631 = vst [vmem:[#allocation11 + $0x40] sm:$0xff] %v627_v59  ;;  %v613_v6 = vsel %vm452_vm4, %v609_v61, %v579_v50  ;;  %v571_v55 = vperm.slane %v377_v26, 3  ;;  %v628_v3 = vsel %vm472_vm5, %v624_v2, 0.0  ;;  %v580_v16 = vperm.slane %v379_v27, 3 }
  0x8b   :  { %v617_v15 = vsel %vm457_vm8, %v613_v6, %v588_v51  ;;  %v589_v53 = vperm.slane %v1426_v10, 3  ;;  %632 = vst [vmem:[#allocation11 + $0x48] sm:$0xff] %v628_v3  ;;  %v598_v4 = vperm.slane %v1430_v31, 3  ;;  %v606_v18 = vsel %vm442_vm10, %v553_v63, %v562_v14 }
  0x8c   :  { %v621_v17 = vsel %vm462_vm13, %v617_v15, %v597_v46  ;;  %v384_v19 = vmul.f32 %v372_v7, %v1310_v8  ;;  %v610_v20 = vsel %vm447_vm15, %v606_v18, %v571_v55  ;;  %v385_v23 = vmul.f32 %v374_v21, %v1312_v9 }
  0x8d   :  { %v625_v54 = vsel %vm467_vm12, %v621_v17, 0.0  ;;  %v386_v22 = vmul.f32 %v376_v5, %v1299_v0  ;;  %v614_v26 = vsel %vm452_vm4, %v610_v20, %v580_v16  ;;  %v387_v27 = vmul.f32 %v378_v24, %v1303_v1 }
  0x8e   :  { %v629_v25 = vsel %vm472_vm5, %v625_v54, 0.0  ;;  %v636_v58 = vperm.slane %v384_v19, 0  ;;  %v618_v8 = vsel %vm457_vm8, %v614_v26, %v589_v53  ;;  %v645_v7 = vperm.slane %v385_v23, 0 }
  0x8f   :  { %633 = vst [vmem:[#allocation11 + $0x50] sm:$0xff] %v629_v25  ;;  %v654_v28 = vperm.slane %v386_v22, 0  ;;  %v637_v29 = vperm.slane %v384_v19, 1  ;;  %v622_v0 = vsel %vm462_vm13, %v618_v8, %v598_v4  ;;  %v663_v9 = vperm.slane %v387_v27, 0 }
  0x90   :  { %v646_v21 = vperm.slane %v385_v23, 1  ;;  %v655_v5 = vperm.slane %v386_v22, 1  ;;  %v626_v30 = vsel %vm467_vm12, %v622_v0, 0.0  ;;  %v671_v1 = vsel %vm442_vm10, %v636_v58, %v645_v7 }
  0x91   :  { %v664_v24 = vperm.slane %v387_v27, 1  ;;  %v638_v11 = vperm.slane %v384_v19, 2  ;;  %v630_v32 = vsel %vm472_vm5, %v626_v30, 0.0  ;;  %v675_v33 = vsel %vm447_vm15, %v671_v1, %v654_v28 }
  0x92   :  { %v672_v12 = vsel %vm442_vm10, %v637_v29, %v646_v21  ;;  %v647_v35 = vperm.slane %v385_v23, 2  ;;  %634 = vst [vmem:[#allocation11 + $0x58] sm:$0xff] %v630_v32  ;;  %v679_v13 = vsel %vm452_vm4, %v675_v33, %v663_v9  ;;  %v656_v37 = vperm.slane %v386_v22, 2 }
  0x93   :  { %v676_v62 = vsel %vm447_vm15, %v672_v12, %v655_v5  ;;  %v665_v40 = vperm.slane %v387_v27, 2  ;;  %v683_v41 = vsel %vm457_vm8, %v679_v13, %v586_v34  ;;  %v639_v44 = vperm.slane %v384_v19, 3 }
  0x94   :  { %v680_v39 = vsel %vm452_vm4, %v676_v62, %v664_v24  ;;  %v673_v43 = vsel %vm442_vm10, %v638_v11, %v647_v35  ;;  %v687_v45 = vsel %vm462_vm13, %v683_v41, %v595_v36  ;;  %v648_v42 = vperm.slane %v385_v23, 3 }
  0x95   :  { %v684_v47 = vsel %vm457_vm8, %v680_v39, %v587_v38  ;;  %v677_v48 = vsel %vm447_vm15, %v673_v43, %v656_v37  ;;  %v691_v50 = vsel %vm467_vm12, %v687_v45, 0.0  ;;  %v657_v56 = vperm.slane %v386_v22, 3 }
  0x96   :  { %v688_v34 = vsel %vm462_vm13, %v684_v47, %v596_v49  ;;  %v681_v52 = vsel %vm452_vm4, %v677_v48, %v665_v40  ;;  %v695_v57 = vsel %vm472_vm5, %v691_v50, 0.0  ;;  %v666_v59 = vperm.slane %v387_v27, 3 }
  0x97   :  { %v692_v36 = vsel %vm467_vm12, %v688_v34, 0.0  ;;  %v685_v38 = vsel %vm457_vm8, %v681_v52, %v588_v51  ;;  %699 = vst [vmem:[#allocation11 + $0x60] sm:$0xff] %v695_v57  ;;  %v674_v49 = vsel %vm442_vm10, %v639_v44, %v648_v42 }
  0x98   :  { %v696_v60 = vsel %vm472_vm5, %v692_v36, 0.0  ;;  %v689_v61 = vsel %vm462_vm13, %v685_v38, %v597_v46  ;;  %v678_v2 = vsel %vm447_vm15, %v674_v49, %v657_v56 }
  0x99   :  { %700 = vst [vmem:[#allocation11 + $0x68] sm:$0xff] %v696_v60  ;;  %v693_v63 = vsel %vm467_vm12, %v689_v61, 0.0  ;;  %v682_v6 = vsel %vm452_vm4, %v678_v2, %v666_v59 }
  0x9a   :  { %v697_v51 = vsel %vm472_vm5, %v693_v63, 0.0  ;;  %v686_v46 = vsel %vm457_vm8, %v682_v6, %v589_v53 }
  0x9b   :  { %701 = vst [vmem:[#allocation11 + $0x70] sm:$0xff] %v697_v51  ;;  %v690_v14 = vsel %vm462_vm13, %v686_v46, %v598_v4 }
  0x9c   :  { %v694_v55 = vsel %vm467_vm12, %v690_v14, 0.0 }
  0x9d   :  { %v698_v3 = vsel %vm472_vm5, %v694_v55, 0.0 }
  0x9e   :  { %702 = vst [vmem:[#allocation11 + $0x78] sm:$0xff] %v698_v3 }
  0x9f   :  { %715 = dma.vmem_to_hbm [thread:$0]  %s708_s11, 2048, %s710_s14, [#allocation4], %s908_s4, %s908_s4, %s909_s15  }
  0xa0   :  { %900 = dma.done.wait [#allocation4], 2048  }
  0xa1   :  { %901 = vsyncadd [#allocation4], 4294965248 }
  0xa2   :  { %720 = vsyncpa [#allocation3], 1 }
  0xa3   :  { %721 = vsyncpa [#allocation4], 1 }
  0xa4   :  { %722 = vsyncpa [#allocation5], 1 }
  0xa5   :  { %723 = vsyncpa [#allocation6], 1 }
  0xa6   :  { %724 = vsyncpa [#allocation10], 1 }

</bundles_post_ra>
